<compile_context>
chip_gen: v7x
topology: tpu7x:2x2x1
jax: 0.10.0
libtpu: 0.0.40
codegen_flags: <defaults>
</compile_context>

<pallas_src>
import jax
import jax.numpy as jnp
from jax.experimental import pallas as pl
from jax.experimental.pallas import tpu as pltpu

NEG_SLOPE = 0.01  # nn.LeakyReLU() default negative_slope
LANE = 128
SUBLANE = 8


def _round_up(x, m):
    return (x + m - 1) // m * m


def _leaky_relu(h):
    # max(h, a*h) == LeakyReLU(h) for 0 < a < 1; drops the compare+select.
    return jnp.maximum(h, NEG_SLOPE * h)


def _make_nbeats_kernel(n_hidden_layers, use_bf16):
    """Kernel args: x_ref, (w_ref, b_ref) * n_hidden_layers, wt_ref, bt_ref, out_ref."""
    dot_dtype = jnp.bfloat16 if use_bf16 else jnp.float32

    def kernel(*refs):
        x_ref = refs[0]
        out_ref = refs[-1]
        params = refs[1:-1]

        h = x_ref[...]  # already in compute dtype (bf16 or f32) from the wrapper
        # Hidden stack: Linear + LeakyReLU, repeated n_layers times.
        # MXU operands in dot_dtype; accumulation, bias add and LeakyReLU in f32.
        for i in range(n_hidden_layers):
            w = params[2 * i][...]
            b = params[2 * i + 1][...]
            h = jnp.dot(h.astype(dot_dtype), w, preferred_element_type=jnp.float32)
            h = _leaky_relu(h + b)
        # Theta head: plain Linear (output zero-padded to a lane-dense width).
        wt = params[-2][...]
        bt = params[-1][...]
        out_ref[...] = (
            jnp.dot(h.astype(dot_dtype), wt, preferred_element_type=jnp.float32) + bt
        ).astype(out_ref.dtype)

    return kernel


def _choose_tile_m(batch, tile_m):
    """Pick the batch tile size.

    - Large tiles (default 4096) amortize the ~0.35 us per-grid-step overhead.
    - If the whole batch fits one tile but is reasonably large, split into two
      grid steps so v7x's two TensorCores both get work.
    - Otherwise a single full-array block (any size equal to the array dim is
      a legal block shape).
    """
    if batch <= tile_m:
        if batch >= 4 * SUBLANE:
            return _round_up(pl.cdiv(batch, 2), SUBLANE)
        return batch
    return _round_up(tile_m, SUBLANE)


def nbeats_block_forward(x, hidden_weights, hidden_biases, theta_w, theta_b,
                         *, tile_m=4096, use_bf16=True):
    """Pallas forward pass of NBeatsBlock.

    x:              (batch, input_size) float32
    hidden_weights: list of (in, out) float32 matrices (already transposed)
    hidden_biases:  list of (1, out) float32
    theta_w:        (hidden, forecast) float32
    theta_b:        (1, forecast) float32
    Returns (batch, forecast) float32.
    """
    n_hidden = len(hidden_weights)
    batch, input_size = x.shape
    forecast_size = theta_w.shape[1]

    # ---- lane-dense output: pad theta head to a multiple of 128 lanes ----
    padded_n = _round_up(forecast_size, LANE)
    theta_w_p = jnp.zeros((theta_w.shape[0], padded_n), jnp.float32)
    theta_w_p = theta_w_p.at[:, :forecast_size].set(theta_w)
    theta_b_p = jnp.zeros((1, padded_n), jnp.float32)
    theta_b_p = theta_b_p.at[:, :forecast_size].set(theta_b)

    # ---- batch tiling: no zero-pad copy; Pallas masks the boundary block ----
    tile_m = _choose_tile_m(batch, tile_m)
    grid = (pl.cdiv(batch, tile_m),)

    # ---- dtype plumbing: bf16 MXU operands (native on v5e/v6e/v7x MXUs),
    #      f32 accumulation/elementwise everywhere. bf16 output slab halves
    #      the dominant writeback DMA; f32 path keeps f32 out for exactness.
    compute_dtype = jnp.bfloat16 if use_bf16 else jnp.float32
    out_dtype = jnp.bfloat16 if use_bf16 else jnp.float32

    x_c = x.astype(compute_dtype)
    hw = [w.astype(compute_dtype) for w in hidden_weights]
    hb = [b.astype(jnp.float32) for b in hidden_biases]
    twt = theta_w_p.astype(compute_dtype)
    tbt = theta_b_p.astype(jnp.float32)

    args = [x_c]
    for w, b in zip(hw, hb):
        args.extend([w, b])
    args.extend([twt, tbt])

    def resident_spec(arr):
        # Constant block index -> weights/biases stay resident in VMEM
        # (one HBM->VMEM copy total, not per grid step).
        return pl.BlockSpec(arr.shape, lambda i: (0, 0))

    in_specs = [pl.BlockSpec((tile_m, input_size), lambda i: (i, 0))]
    in_specs += [resident_spec(a) for a in args[1:]]
    out_specs = pl.BlockSpec((tile_m, padded_n), lambda i: (i, 0))

    kernel = _make_nbeats_kernel(n_hidden, use_bf16)

    # VMEM footprint at default tile_m=4096: out block <= 2 MiB (f32) / 1 MiB
    # (bf16) x2 buffers, x block ~256 KiB, weights < 100 KiB -- comfortably
    # under even v5e's 16 MiB scoped default, so no vmem_limit_bytes needed.
    out_p = pl.pallas_call(
        kernel,
        out_shape=jax.ShapeDtypeStruct((batch, padded_n), out_dtype),
        grid=grid,
        in_specs=in_specs,
        out_specs=out_specs,
        compiler_params=pltpu.CompilerParams(
            dimension_semantics=("parallel",),  # shards batch tiles across TCs on v7x
        ),
    )(*args)

    # Slice back to the logical (batch, forecast_size) result in f32.
    return out_p[:, :forecast_size].astype(jnp.float32)


def nbeats_block_reference(x, hidden_weights, hidden_biases, theta_w, theta_b):
    """Pure-JAX reference mirroring the PyTorch forward (f32 end-to-end)."""
    h = x
    for w, b in zip(hidden_weights, hidden_biases):
        h = h @ w + b
        h = jnp.where(h > 0, h, NEG_SLOPE * h)
    return h @ theta_w + theta_b


def init_params(key, input_size, forecast_size, hidden_size, n_layers):
    """Deterministic synthetic parameters matching NBeatsBlock.__init__ shapes."""
    hidden_weights, hidden_biases = [], []
    in_dim = input_size
    for _ in range(n_layers):
        key, kw, kb = jax.random.split(key, 3)
        hidden_weights.append(
            0.05 * jax.random.normal(kw, (in_dim, hidden_size), jnp.float32)
        )
        hidden_biases.append(
            0.05 * jax.random.normal(kb, (1, hidden_size), jnp.float32)
        )
        in_dim = hidden_size
    key, kw, kb = jax.random.split(key, 3)
    theta_w = 0.05 * jax.random.normal(kw, (hidden_size, forecast_size), jnp.float32)
    theta_b = 0.05 * jax.random.normal(kb, (1, forecast_size), jnp.float32)
    return hidden_weights, hidden_biases, theta_w, theta_b


if __name__ == "__main__":
    input_size = 16
    forecast_size = 8
    hidden_size = 32
    n_layers = 3

    key = jax.random.PRNGKey(0)
    key, kparams = jax.random.split(key)
    hidden_weights, hidden_biases, theta_w, theta_b = init_params(
        kparams, input_size, forecast_size, hidden_size, n_layers
    )

    # Two batch sizes: 8 (single full block) and 37 (2-step grid with a masked
    # boundary block -> exercises the no-explicit-pad path).
    for batch in (8, 37):
        key, kx = jax.random.split(key)
        x = jax.random.normal(kx, (batch, input_size), jnp.float32)

        ref = nbeats_block_reference(x, hidden_weights, hidden_biases, theta_w, theta_b)

        # f32 path: exact match with the reference.
        out_f32 = nbeats_block_forward(
            x, hidden_weights, hidden_biases, theta_w, theta_b, use_bf16=False
        )
        out_f32 = jax.block_until_ready(out_f32)
        assert out_f32.shape == (batch, forecast_size)
        assert jnp.allclose(out_f32, ref, atol=1e-5, rtol=1e-5), (
            f"f32 mismatch vs reference (batch={batch})"
        )

        # bf16-operand / bf16-output path (default): looser tolerance.
        out_bf16 = nbeats_block_forward(
            x, hidden_weights, hidden_biases, theta_w, theta_b, use_bf16=True
        )
        out_bf16 = jax.block_until_ready(out_bf16)
        assert out_bf16.shape == (batch, forecast_size)
        assert jnp.allclose(out_bf16, ref, atol=2e-2, rtol=2e-2), (
            f"bf16 mismatch vs reference (batch={batch})"
        )

    print("KERNEL_OK")
</pallas_src>

<mosaic_0001>
module attributes {stable_mosaic.version = 11 : i64} {
  func.func @kernel(%arg0: i32, %arg1: memref<8x16xf32, #tpu.memory_space<vmem>>, %arg2: memref<16x32xf32, #tpu.memory_space<vmem>>, %arg3: memref<1x32xf32, #tpu.memory_space<vmem>>, %arg4: memref<32x32xf32, #tpu.memory_space<vmem>>, %arg5: memref<1x32xf32, #tpu.memory_space<vmem>>, %arg6: memref<32x32xf32, #tpu.memory_space<vmem>>, %arg7: memref<1x32xf32, #tpu.memory_space<vmem>>, %arg8: memref<32x128xf32, #tpu.memory_space<vmem>>, %arg9: memref<1x128xf32, #tpu.memory_space<vmem>>, %arg10: memref<8x128xf32, #tpu.memory_space<vmem>>) attributes {dimension_semantics = [#tpu.dimension_semantics<parallel>], iteration_bounds = array<i64: 1>, scalar_prefetch = 0 : i64, scratch_operands = 0 : i64, tpu.core_type = #tpu.core_type<tc>, window_params = [{transform_indices = @transform_0, window_bounds = array<i64: 8, 16>}, {pipeline_mode = #tpu.pipeline_mode<synchronous>, transform_indices = @transform_1, window_bounds = array<i64: 16, 32>}, {pipeline_mode = #tpu.pipeline_mode<synchronous>, transform_indices = @transform_2, window_bounds = array<i64: 1, 32>}, {pipeline_mode = #tpu.pipeline_mode<synchronous>, transform_indices = @transform_3, window_bounds = array<i64: 32, 32>}, {pipeline_mode = #tpu.pipeline_mode<synchronous>, transform_indices = @transform_4, window_bounds = array<i64: 1, 32>}, {pipeline_mode = #tpu.pipeline_mode<synchronous>, transform_indices = @transform_5, window_bounds = array<i64: 32, 32>}, {pipeline_mode = #tpu.pipeline_mode<synchronous>, transform_indices = @transform_6, window_bounds = array<i64: 1, 32>}, {pipeline_mode = #tpu.pipeline_mode<synchronous>, transform_indices = @transform_7, window_bounds = array<i64: 32, 128>}, {pipeline_mode = #tpu.pipeline_mode<synchronous>, transform_indices = @transform_8, window_bounds = array<i64: 1, 128>}, {transform_indices = @transform_9, window_bounds = array<i64: 8, 128>}]} {
    %c0 = arith.constant 0 : index
    %c0_0 = arith.constant 0 : index
    %0 = vector.load %arg1[%c0, %c0_0] : memref<8x16xf32, #tpu.memory_space<vmem>>, vector<8x16xf32>
    %c0_1 = arith.constant 0 : index
    %c0_2 = arith.constant 0 : index
    %1 = vector.load %arg2[%c0_1, %c0_2] : memref<16x32xf32, #tpu.memory_space<vmem>>, vector<16x32xf32>
    %c0_3 = arith.constant 0 : index
    %c0_4 = arith.constant 0 : index
    %2 = vector.load %arg3[%c0_3, %c0_4] : memref<1x32xf32, #tpu.memory_space<vmem>>, vector<1x32xf32>
    %cst = arith.constant dense<0.000000e+00> : vector<8x32xf32>
    %3 = tpu.matmul %0, %1, %cst {dimension_numbers = #tpu.dot_dimension_numbers<[1], [0], [0], [1], [0, 0, 1, 1], [], []>} : vector<8x16xf32>, vector<16x32xf32>, vector<8x32xf32> -> vector<8x32xf32>
    %4 = vector.broadcast %2 : vector<1x32xf32> to vector<8x32xf32>
    %5 = arith.addf %3, %4 : vector<8x32xf32>
    %cst_5 = arith.constant 0.00999999977 : f32
    %6 = vector.broadcast %cst_5 : f32 to vector<8x32xf32>
    %7 = arith.mulf %6, %5 : vector<8x32xf32>
    %8 = arith.maximumf %5, %7 : vector<8x32xf32>
    %c0_6 = arith.constant 0 : index
    %c0_7 = arith.constant 0 : index
    %9 = vector.load %arg4[%c0_6, %c0_7] : memref<32x32xf32, #tpu.memory_space<vmem>>, vector<32x32xf32>
    %c0_8 = arith.constant 0 : index
    %c0_9 = arith.constant 0 : index
    %10 = vector.load %arg5[%c0_8, %c0_9] : memref<1x32xf32, #tpu.memory_space<vmem>>, vector<1x32xf32>
    %cst_10 = arith.constant dense<0.000000e+00> : vector<8x32xf32>
    %11 = tpu.matmul %8, %9, %cst_10 {dimension_numbers = #tpu.dot_dimension_numbers<[1], [0], [0], [1], [0, 0, 1, 1], [], []>} : vector<8x32xf32>, vector<32x32xf32>, vector<8x32xf32> -> vector<8x32xf32>
    %12 = vector.broadcast %10 : vector<1x32xf32> to vector<8x32xf32>
    %13 = arith.addf %11, %12 : vector<8x32xf32>
    %cst_11 = arith.constant 0.00999999977 : f32
    %14 = vector.broadcast %cst_11 : f32 to vector<8x32xf32>
    %15 = arith.mulf %14, %13 : vector<8x32xf32>
    %16 = arith.maximumf %13, %15 : vector<8x32xf32>
    %c0_12 = arith.constant 0 : index
    %c0_13 = arith.constant 0 : index
    %17 = vector.load %arg6[%c0_12, %c0_13] : memref<32x32xf32, #tpu.memory_space<vmem>>, vector<32x32xf32>
    %c0_14 = arith.constant 0 : index
    %c0_15 = arith.constant 0 : index
    %18 = vector.load %arg7[%c0_14, %c0_15] : memref<1x32xf32, #tpu.memory_space<vmem>>, vector<1x32xf32>
    %cst_16 = arith.constant dense<0.000000e+00> : vector<8x32xf32>
    %19 = tpu.matmul %16, %17, %cst_16 {dimension_numbers = #tpu.dot_dimension_numbers<[1], [0], [0], [1], [0, 0, 1, 1], [], []>} : vector<8x32xf32>, vector<32x32xf32>, vector<8x32xf32> -> vector<8x32xf32>
    %20 = vector.broadcast %18 : vector<1x32xf32> to vector<8x32xf32>
    %21 = arith.addf %19, %20 : vector<8x32xf32>
    %cst_17 = arith.constant 0.00999999977 : f32
    %22 = vector.broadcast %cst_17 : f32 to vector<8x32xf32>
    %23 = arith.mulf %22, %21 : vector<8x32xf32>
    %24 = arith.maximumf %21, %23 : vector<8x32xf32>
    %c0_18 = arith.constant 0 : index
    %c0_19 = arith.constant 0 : index
    %25 = vector.load %arg8[%c0_18, %c0_19] : memref<32x128xf32, #tpu.memory_space<vmem>>, vector<32x128xf32>
    %c0_20 = arith.constant 0 : index
    %c0_21 = arith.constant 0 : index
    %26 = vector.load %arg9[%c0_20, %c0_21] : memref<1x128xf32, #tpu.memory_space<vmem>>, vector<1x128xf32>
    %cst_22 = arith.constant dense<0.000000e+00> : vector<8x128xf32>
    %27 = tpu.matmul %24, %25, %cst_22 {dimension_numbers = #tpu.dot_dimension_numbers<[1], [0], [0], [1], [0, 0, 1, 1], [], []>} : vector<8x32xf32>, vector<32x128xf32>, vector<8x128xf32> -> vector<8x128xf32>
    %28 = vector.broadcast %26 : vector<1x128xf32> to vector<8x128xf32>
    %29 = arith.addf %27, %28 : vector<8x128xf32>
    %c0_23 = arith.constant 0 : index
    %c0_24 = arith.constant 0 : index
    %30 = vector.load %arg10[%c0_23, %c0_24] : memref<8x128xf32, #tpu.memory_space<vmem>>, vector<8x128xf32>
    tpu.vector_store %arg10[%c0_23, %c0_24], %29 {strides = array<i32>} : memref<8x128xf32, #tpu.memory_space<vmem>>, vector<8x128xf32>,
    return
  }
  func.func @transform_0(%arg0: i32) -> (i32, i32) {
    %c0_i32 = arith.constant 0 : i32
    %c0_i32_0 = arith.constant 0 : i32
    return %arg0, %c0_i32 : i32, i32
  }
  func.func @transform_1(%arg0: i32) -> (i32, i32) {
    %c0_i32 = arith.constant 0 : i32
    %c0_i32_0 = arith.constant 0 : i32
    %c0_i32_1 = arith.constant 0 : i32
    return %c0_i32, %c0_i32_0 : i32, i32
  }
  func.func @transform_2(%arg0: i32) -> (i32, i32) {
    %c0_i32 = arith.constant 0 : i32
    %c0_i32_0 = arith.constant 0 : i32
    %c0_i32_1 = arith.constant 0 : i32
    return %c0_i32, %c0_i32_0 : i32, i32
  }
  func.func @transform_3(%arg0: i32) -> (i32, i32) {
    %c0_i32 = arith.constant 0 : i32
    %c0_i32_0 = arith.constant 0 : i32
    %c0_i32_1 = arith.constant 0 : i32
    return %c0_i32, %c0_i32_0 : i32, i32
  }
  func.func @transform_4(%arg0: i32) -> (i32, i32) {
    %c0_i32 = arith.constant 0 : i32
    %c0_i32_0 = arith.constant 0 : i32
    %c0_i32_1 = arith.constant 0 : i32
    return %c0_i32, %c0_i32_0 : i32, i32
  }
  func.func @transform_5(%arg0: i32) -> (i32, i32) {
    %c0_i32 = arith.constant 0 : i32
    %c0_i32_0 = arith.constant 0 : i32
    %c0_i32_1 = arith.constant 0 : i32
    return %c0_i32, %c0_i32_0 : i32, i32
  }
  func.func @transform_6(%arg0: i32) -> (i32, i32) {
    %c0_i32 = arith.constant 0 : i32
    %c0_i32_0 = arith.constant 0 : i32
    %c0_i32_1 = arith.constant 0 : i32
    return %c0_i32, %c0_i32_0 : i32, i32
  }
  func.func @transform_7(%arg0: i32) -> (i32, i32) {
    %c0_i32 = arith.constant 0 : i32
    %c0_i32_0 = arith.constant 0 : i32
    %c0_i32_1 = arith.constant 0 : i32
    return %c0_i32, %c0_i32_0 : i32, i32
  }
  func.func @transform_8(%arg0: i32) -> (i32, i32) {
    %c0_i32 = arith.constant 0 : i32
    %c0_i32_0 = arith.constant 0 : i32
    %c0_i32_1 = arith.constant 0 : i32
    return %c0_i32, %c0_i32_0 : i32, i32
  }
  func.func @transform_9(%arg0: i32) -> (i32, i32) {
    %c0_i32 = arith.constant 0 : i32
    %c0_i32_0 = arith.constant 0 : i32
    return %arg0, %c0_i32 : i32, i32
  }
}

</mosaic_0001>

<bundles_post_ra>
// kernel: tpu_custom_call.1
= control target key start
LH: loop header
LB: loop body
LE: loop exit
PB: predicated region body
PF: predicated region fallthrough
CT: control target
= control target key end

     0   :  { %14 = vsyncpa [#allocation3], 0  ;;  %s862_s0 = inlined_call_operand.hbm [shape: f32[8,16], index: 0, kind: input, shape index: {}]   ;;  %s863_s1 = inlined_call_operand.hbm [shape: f32[16,32], index: 1, kind: input, shape index: {}]   ;;  %s864_s2 = inlined_call_operand.vmem [shape: f32[1,32], index: 2, kind: input, shape index: {}]   ;;  %s865_s3 = inlined_call_operand.hbm [shape: f32[32,32], index: 3, kind: input, shape index: {}]   ;;  %s866_s4 = inlined_call_operand.vmem [shape: f32[1,32], index: 4, kind: input, shape index: {}]   ;;  %s867_s5 = inlined_call_operand.hbm [shape: f32[32,32], index: 5, kind: input, shape index: {}]   ;;  %s868_s6 = inlined_call_operand.vmem [shape: f32[1,32], index: 6, kind: input, shape index: {}]   ;;  %s869_s7 = inlined_call_operand.hbm [shape: f32[32,128], index: 7, kind: input, shape index: {}]   ;;  %s870_s8 = inlined_call_operand.vmem [shape: f32[1,128], index: 8, kind: input, shape index: {}]   ;;  %s871_s9 = inlined_call_operand.hbm [shape: f32[8,128], index: 9, kind: output, shape index: {}]  }
   0x1   :  { %15 = vsyncpa [#allocation6], 0 }
   0x2   :  { %16 = vsyncpa [#allocation9], 0 }
   0x3   :  { %17 = vsyncpa [#allocation4], 0  ;;  %s698_s30 = smov [#allocation5]   ;;  %s558_s13 = scalar_lea.hbm %s863_s1, 256 }
   0x4   :  { %s33_s10 = sshll.u32 %s698_s30, 4  ;;  %p559_p0 = scmp.ne.s32.totalorder %s863_s1, %s558_s13  ;;  %s34_s10 = int_to_ptr.vmem [resolvable:$true] %s33_s10 }
   0x5   :  { %p562_p1 = scmp.lt.u32.totalorder %s558_s13, %s863_s1 }
   0x7   :  { %p564_p2 = pnand %p562_p1, %p559_p0 }
   0x9   :  { %567 = shalt.err (!%p564_p2)
}
   0xa   :  { %s568_s18 = scalar_lea.vmem %s34_s10, 256  ;;  %p573_p4 = scmp.lt.s32.totalorder %s34_s10, %s34_s10 }
   0xb   :  { %p569_p3 = scmp.ne.s32.totalorder %s34_s10, %s568_s18  ;;  %p574_p5 = scmp.lt.s32.totalorder %s568_s18, %s568_s18 }
   0xd   :  { %p575_p6 = por %p574_p5, %p573_p4 }
   0xf   :  { %p576_p7 = pnand %p575_p6, %p569_p3 }
  0x11   :  { %579 = shalt.err (!%p576_p7)
}
  0x12   :  { %s699_s19 = smov 128   ;;  %s700_s20 = smov 8  }
  0x13   :  { %39 = dma.hbm_to_vmem [thread:$0]  %s863_s1, 256, %s34_s10, [#allocation6], %s699_s19, %s699_s19, %s700_s20  }
  0x14   :  { %s701_s23 = smov [#allocation8]   ;;  %s702_s25 = smov [#allocation2]  }
  0x15   :  { %s61_s24 = sshll.u32 %s701_s23, 4  ;;  %s24_s26 = sshll.u32 %s702_s25, 4  ;;  %s62_s24 = int_to_ptr.vmem [resolvable:$true] %s61_s24  ;;  %s25_s26 = int_to_ptr.vmem [resolvable:$true] %s24_s26 }
  0x16   :  { %s580_s29 = scalar_lea.hbm %s867_s5, 512 }
  0x17   :  { %p581_p8 = scmp.ne.s32.totalorder %s867_s5, %s580_s29  ;;  %p584_p9 = scmp.lt.u32.totalorder %s580_s29, %s867_s5 }
  0x19   :  { %p586_p10 = pnand %p584_p9, %p581_p8 }
  0x1b   :  { %589 = shalt.err (!%p586_p10)
}
  0x1c   :  { %s590_s1 = scalar_lea.vmem %s62_s24, 512  ;;  %p595_p12 = scmp.lt.s32.totalorder %s62_s24, %s62_s24 }
  0x1d   :  { %p591_p11 = scmp.ne.s32.totalorder %s62_s24, %s590_s1  ;;  %p596_p13 = scmp.lt.s32.totalorder %s590_s1, %s590_s1 }
  0x1f   :  { %p597_p0 = por %p596_p13, %p595_p12 }
  0x21   :  { %p598_p1 = pnand %p597_p0, %p591_p11 }
  0x23   :  { %601 = shalt.err (!%p598_p1)
}
  0x24   :  { %67 = dma.hbm_to_vmem [thread:$0]  %s867_s5, 512, %s62_s24, [#allocation9], %s699_s19, %s699_s19, %s700_s20  }
  0x25   :  { %s602_s17 = scalar_lea.hbm %s862_s0, 128 }
  0x26   :  { %p603_p2 = scmp.ne.s32.totalorder %s862_s0, %s602_s17  ;;  %p606_p3 = scmp.lt.u32.totalorder %s602_s17, %s862_s0 }
  0x28   :  { %p608_p4 = pnand %p606_p3, %p603_p2 }
  0x2a   :  { %611 = shalt.err (!%p608_p4)
}
  0x2b   :  { %s612_s25 = scalar_lea.vmem %s25_s26, 128  ;;  %p617_p6 = scmp.lt.s32.totalorder %s25_s26, %s25_s26 }
  0x2c   :  { %p613_p5 = scmp.ne.s32.totalorder %s25_s26, %s612_s25  ;;  %p618_p7 = scmp.lt.s32.totalorder %s612_s25, %s612_s25 }
  0x2e   :  { %p619_p8 = por %p618_p7, %p617_p6 }
  0x30   :  { %p620_p9 = pnand %p619_p8, %p613_p5 }
  0x32   :  { %623 = shalt.err (!%p620_p9)
}
  0x33   :  { %27 = dma.hbm_to_vmem [thread:$0]  %s862_s0, 128, %s25_s26, [#allocation3]  }
  0x34   :  { %s703_s27 = smov [#allocation7]   ;;  %s704_s29 = smov [#allocation10]  }
  0x35   :  { %s47_s28 = sshll.u32 %s703_s27, 4  ;;  %s75_s30 = sshll.u32 %s704_s29, 4  ;;  %s48_s28 = int_to_ptr.vmem [resolvable:$true] %s47_s28  ;;  %s76_s30 = int_to_ptr.vmem [resolvable:$true] %s75_s30 }
  0x36   :  { %s624_s13 = scalar_lea.hbm %s865_s3, 512 }
  0x37   :  { %p625_p10 = scmp.ne.s32.totalorder %s865_s3, %s624_s13  ;;  %p628_p11 = scmp.lt.u32.totalorder %s624_s13, %s865_s3 }
  0x39   :  { %p630_p12 = pnand %p628_p11, %p625_p10 }
  0x3b   :  { %633 = shalt.err (!%p630_p12)
}
  0x3c   :  { %s634_s0 = scalar_lea.vmem %s48_s28, 512  ;;  %p639_p0 = scmp.lt.s32.totalorder %s48_s28, %s48_s28 }
  0x3d   :  { %p635_p13 = scmp.ne.s32.totalorder %s48_s28, %s634_s0  ;;  %p640_p1 = scmp.lt.s32.totalorder %s634_s0, %s634_s0 }
  0x3f   :  { %p641_p2 = por %p640_p1, %p639_p0 }
  0x41   :  { %p642_p3 = pnand %p641_p2, %p635_p13 }
  0x43   :  { %645 = shalt.err (!%p642_p3)
}
  0x44   :  { %53 = dma.hbm_to_vmem [thread:$0]  %s865_s3, 512, %s48_s28, [#allocation6], %s699_s19, %s699_s19, %s700_s20  }
  0x45   :  { %s646_s21 = scalar_lea.hbm %s869_s7, 512 }
  0x46   :  { %p647_p4 = scmp.ne.s32.totalorder %s869_s7, %s646_s21  ;;  %p650_p5 = scmp.lt.u32.totalorder %s646_s21, %s869_s7 }
  0x48   :  { %p652_p6 = pnand %p650_p5, %p647_p4 }
  0x4a   :  { %655 = shalt.err (!%p652_p6)
}
  0x4b   :  { %s656_s24 = scalar_lea.vmem %s76_s30, 512  ;;  %p661_p8 = scmp.lt.s32.totalorder %s76_s30, %s76_s30 }
  0x4c   :  { %p657_p7 = scmp.ne.s32.totalorder %s76_s30, %s656_s24  ;;  %p662_p9 = scmp.lt.s32.totalorder %s656_s24, %s656_s24 }
  0x4e   :  { %p663_p10 = por %p662_p9, %p661_p8 }
  0x50   :  { %p664_p11 = pnand %p663_p10, %p657_p7 }
  0x52   :  { %667 = shalt.err (!%p664_p11)
}
  0x53   :  { %81 = dma.hbm_to_vmem [thread:$0]  %s869_s7, 512, %s76_s30, [#allocation9], %s699_s19, %s699_s19, %s700_s20  }
  0x54   :  { %690 = dma.done.wait [#allocation3], 128  }
  0x55   :  { %691 = vsyncadd [#allocation3], 4294967168 }
  0x56   :  { %692 = dma.done.wait [#allocation6], 768  }
  0x57   :  { %693 = vsyncadd [#allocation6], 4294966528 }
  0x58   :  { %694 = dma.done.wait [#allocation9], 1024  }
  0x59   :  { %695 = vsyncadd [#allocation9], 4294966272  ;;  %v705_v0 = vmov 0.0|0.0   ;;  %vm706_vm0 = vmmov 0   ;;  %v707_v1 = vmov 0.0   ;;  %v100_v2 = vld [vmem:[#allocation5] sm:$0xff] }
  0x5a   :  { %526 = vmatprep.subr.bf16.mxu0 %v705_v0  ;;  %490 = vmatprep.mubr.msk.f32.mxu0 %vm706_vm0, %v707_v1  ;;  %v101_v3 = vld [vmem:[#allocation5 + $0x8] sm:$0xff]  ;;  %v99_v5 = vld [vmem:[#allocation2] sm:$0xff]  ;;  %vm109_vm1 = vcmask 130048   ;;  %v185_v6 = vld [vmem:[#allocation7] sm:$0xff]  ;;  %vm196_vm2 = vcmask 261120   ;;  %s708_s11 = smov [#allocation11]  }
  0x5b   :  { %529 = vmatprep.subr.bf16.mxu1 %v705_v0  ;;  %501 = vmatprep.mubr.msk.f32.mxu1 %vm706_vm0, %v707_v1  ;;  %v527_v4 = vpack.c.bf16 %v101_v3, %v100_v2  ;;  %v186_v7 = vld [vmem:[#allocation7 + $0x8] sm:$0xff]  ;;  %v187_v9 = vld [vmem:[#allocation7 + $0x10] sm:$0xff]  ;;  %v188_v10 = vld [vmem:[#allocation7 + $0x18] sm:$0xff]  ;;  %s449_s12 = sshll.u32 %s708_s11, 4  ;;  %s450_s12 = int_to_ptr.vmem [resolvable:$true] %s449_s12 }
  0x5c   :  { %v530_v8 = vpack.c.bf16 %v186_v7, %v185_v6  ;;  %v533_v11 = vpack.c.bf16 %v188_v10, %v187_v9  ;;  %v460_v12 = vld [vmem:[%s864_s2] ss:$0 sm:$0xff]  ;;  %v272_v18 = vld [vmem:[#allocation8] sm:$0xff]  ;;  %v274_v21 = vld [vmem:[#allocation8 + $0x10] sm:$0xff]  ;;  %s668_s13 = scalar_lea.vmem %s450_s12, 128  ;;  %p673_p13 = scmp.lt.s32.totalorder %s450_s12, %s450_s12 }
  0x5d   :  { %528 = vmatpush3.bf16.msra.mxu0 %v527_v4  ;;  %v273_v19 = vld [vmem:[#allocation8 + $0x8] sm:$0xff]  ;;  %v275_v22 = vld [vmem:[#allocation8 + $0x18] sm:$0xff]  ;;  %v358_v30 = vld [vmem:[#allocation10] sm:$0xff]  ;;  %p669_p12 = scmp.ne.s32.totalorder %s450_s12, %s668_s13  ;;  %p674_p0 = scmp.lt.s32.totalorder %s668_s13, %s668_s13 }
  0x5e   :  { %535 = vmatprep.subr.bf16.mxu0 %v705_v0  ;;  %531 = vmatpush3.bf16.msra.mxu1 %v530_v8  ;;  %v536_v20 = vpack.c.bf16 %v273_v19, %v272_v18  ;;  %v539_v23 = vpack.c.bf16 %v275_v22, %v274_v21  ;;  %v462_v24 = vld [vmem:[%s866_s4] ss:$0 sm:$0xff]  ;;  %v360_v33 = vld [vmem:[#allocation10 + $0x10] sm:$0xff]  ;;  %v361_v34 = vld [vmem:[#allocation10 + $0x18] sm:$0xff] }
  0x5f   :  { %532 = vmatprep.subr.bf16.mxu1 %v705_v0  ;;  %v359_v31 = vld [vmem:[#allocation10 + $0x8] sm:$0xff]  ;;  %v545_v35 = vpack.c.bf16 %v361_v34, %v360_v33  ;;  %p675_p1 = por %p674_p0, %p673_p13 }
  0x60   :  { %491 = vmatmul.mubr.msk.f32.vlgmr.msra.gmra.mrb[0].mxu0 %vm109_vm1, %v99_v5  ;;  %v542_v32 = vpack.c.bf16 %v359_v31, %v358_v30  ;;  %v464_v36 = vld [vmem:[%s868_s6] ss:$0 sm:$0xff] }
  0x61   :  { %512 = vmatprep.mubr.msk.f32.mxu0 %vm706_vm0, %v707_v1  ;;  %537 = vmatpush3.bf16.msra.mxu0 %v536_v20  ;;  %v466_v42 = vld [vmem:[%s870_s8] ss:$0 sm:$0xff]  ;;  %p676_p2 = pnand %p675_p1, %p669_p12 }
  0x62   :  { %534 = vmatpush3.bf16.msra.mxu1 %v533_v11  ;;  %538 = vmatprep.subr.bf16.mxu0 %v705_v0 }
  0x63   :  { %541 = vmatprep.subr.bf16.mxu1 %v705_v0 }
  0x65   :  { %540 = vmatpush3.bf16.msra.mxu0 %v539_v23 }
 0x133   :  { %v179_v13 = vpop.f32.mrb[0].mxu0 }
 0x134   :  { %v180_v14 = vadd.f32 %v460_v12, %v179_v13  ;;  %v492_v15 = vpop.f32.mrb[1].mxu0 }
 0x136   :  { %v183_v16 = vmul.f32 0.01, %v180_v14 }
 0x138   :  { %v184_v17 = vmax.f32 %v180_v14, %v183_v16 }
 0x13a   :  { %502 = vmatmul.mubr.msk.f32.vlgmr.msra.gmra.mrb[0].mxu1 %vm196_vm2, %v184_v17 }
 0x13b   :  { %523 = vmatprep.mubr.msk.f32.mxu1 %vm706_vm0, %v707_v1  ;;  %543 = vmatpush3.bf16.msra.mxu1 %v542_v32 }
 0x13c   :  { %544 = vmatprep.subr.bf16.mxu1 %v705_v0 }
 0x13f   :  { %546 = vmatpush3.bf16.msra.mxu1 %v545_v35 }
 0x20d   :  { %v266_v25 = vpop.f32.mrb[0].mxu1 }
 0x20e   :  { %v267_v26 = vadd.f32 %v462_v24, %v266_v25  ;;  %v503_v27 = vpop.f32.mrb[1].mxu1 }
 0x210   :  { %v270_v28 = vmul.f32 0.01, %v267_v26 }
 0x212   :  { %v271_v29 = vmax.f32 %v267_v26, %v270_v28 }
 0x214   :  { %513 = vmatmul.mubr.msk.f32.vlgmr.msra.gmra.mrb[2].mxu0 %vm196_vm2, %v271_v29 }
 0x2e7   :  { %v352_v37 = vpop.f32.mrb[2].mxu0 }
 0x2e8   :  { %v353_v38 = vadd.f32 %v464_v36, %v352_v37  ;;  %v514_v39 = vpop.f32.mrb[3].mxu0 }
 0x2ea   :  { %v356_v40 = vmul.f32 0.01, %v353_v38 }
 0x2ec   :  { %v357_v41 = vmax.f32 %v353_v38, %v356_v40 }
 0x2ee   :  { %524 = vmatmul.mubr.msk.f32.vlgmr.msra.gmra.mrb[2].mxu1 %vm196_vm2, %v357_v41 }
 0x3c1   :  { %v438_v43 = vpop.f32.mrb[2].mxu1 }
 0x3c2   :  { %v439_v44 = vadd.f32 %v466_v42, %v438_v43  ;;  %v525_v45 = vpop.f32.mrb[3].mxu1 }
 0x3c4   :  { %442 = vst [vmem:[#allocation11] sm:$0xff] %v439_v44 }
 0x3c5   :  { %679 = shalt.err (!%p676_p2)
}
 0x3c6   :  { %s680_s10 = scalar_lea.hbm %s871_s9, 128 }
 0x3c7   :  { %p681_p3 = scmp.ne.s32.totalorder %s871_s9, %s680_s10  ;;  %p684_p4 = scmp.lt.u32.totalorder %s680_s10, %s871_s9 }
 0x3c9   :  { %p686_p5 = pnand %p684_p4, %p681_p3 }
 0x3cb   :  { %689 = shalt.err (!%p686_p5)
}
 0x3cc   :  { %452 = dma.vmem_to_hbm [thread:$0]  %s450_s12, 128, %s871_s9, [#allocation4]  }
 0x3cd   :  { %696 = dma.done.wait [#allocation4], 128  }
 0x3ce   :  { %697 = vsyncadd [#allocation4], 4294967168 }
 0x3cf   :  { %456 = vsyncpa [#allocation3], 1 }
 0x3d0   :  { %457 = vsyncpa [#allocation6], 1 }
 0x3d1   :  { %458 = vsyncpa [#allocation9], 1 }
 0x3d2   :  { %459 = vsyncpa [#allocation4], 1 }

</bundles_post_ra>
